<compile_context>
chip_gen: v7x
topology: tpu7x:2x2x1
jax: 0.10.0
libtpu: 0.0.40
codegen_flags: <defaults>
</compile_context>

<pallas_src>
import functools

import jax
import jax.numpy as jnp
from jax.experimental import pallas as pl
from jax.experimental.pallas import tpu as pltpu

LANE = 128
SUBLANE = 8
_MAX_SINGLE_STEP_ROWS = 256   # single grid step up to this many (padded) rows
_BATCH_TILE = 256             # tile height for large batches


def _round_up(x, m):
    return ((x + m - 1) // m) * m


def _erf(x):
    """Abramowitz & Stegun 7.1.26 erf approximation, |err| <= 1.5e-7.

    Uses only mul/add/exp/compare/select (VPU + one EUP exp), which lower
    cleanly in Mosaic on every TPU generation.
    """
    p = 0.3275911
    a1, a2, a3, a4, a5 = (0.254829592, -0.284496736, 1.421413741,
                          -1.453152027, 1.061405429)
    ax = jnp.abs(x)
    t = 1.0 / (1.0 + p * ax)
    poly = ((((a5 * t + a4) * t + a3) * t + a2) * t + a1) * t
    y = 1.0 - poly * jnp.exp(-ax * ax)
    return jnp.where(x < 0.0, -y, y)


def _gelu_exact(x):
    # Matches torch.nn.GELU() (erf-based, approximate='none'); runs in f32.
    return 0.5 * x * (1.0 + _erf(x * 0.7071067811865476))


def _ebm_mlp_kernel(z_ref, w1_ref, b1_ref, w2_ref, b2_ref, w3_ref, b3_ref,
                    out_ref):
    """One batch tile per grid step; intermediates never leave VMEM.

    z_ref  : (TB, Din_p)   f32 lane-dense padded latents
    w*_ref : (in_p, out_p) bf16 padded weights in (in, out) layout
    b*_ref : (1, out_p)    f32 padded biases
    out_ref: (TB, Dout_p)  f32
    Matmuls run with bf16 operands + f32 accumulation; GELU path stays f32.
    """
    x = z_ref[...].astype(jnp.bfloat16)
    h = jnp.dot(x, w1_ref[...], preferred_element_type=jnp.float32) + b1_ref[...]
    h = _gelu_exact(h)
    h = jnp.dot(h.astype(jnp.bfloat16), w2_ref[...],
                preferred_element_type=jnp.float32) + b2_ref[...]
    h = _gelu_exact(h)
    o = jnp.dot(h.astype(jnp.bfloat16), w3_ref[...],
                preferred_element_type=jnp.float32) + b3_ref[...]
    out_ref[...] = o.astype(out_ref.dtype)


def prepare_ebm_prior_params(w1, b1, w2, b2, w3, b3):
    """Pad + transpose nn.Linear parameters ONCE (hoisted out of forward).

    w1: (mid, latent), w2: (mid, mid), w3: (out, mid)  -- PyTorch (out, in).
    Returns lane-dense padded (in, out) bf16 weights and f32 (1, out) biases.
    """
    d_mid, d_in = w1.shape
    out_dim = w3.shape[0]
    d_in_p = _round_up(d_in, LANE)
    d_mid_p = _round_up(d_mid, LANE)
    d_out_p = _round_up(out_dim, LANE)

    w1_p = jnp.zeros((d_in_p, d_mid_p), jnp.bfloat16)
    w1_p = w1_p.at[:d_in, :d_mid].set(w1.T.astype(jnp.bfloat16))
    w2_p = jnp.zeros((d_mid_p, d_mid_p), jnp.bfloat16)
    w2_p = w2_p.at[:d_mid, :d_mid].set(w2.T.astype(jnp.bfloat16))
    w3_p = jnp.zeros((d_mid_p, d_out_p), jnp.bfloat16)
    w3_p = w3_p.at[:d_mid, :out_dim].set(w3.T.astype(jnp.bfloat16))
    b1_p = jnp.zeros((1, d_mid_p), jnp.float32).at[0, :d_mid].set(b1.astype(jnp.float32))
    b2_p = jnp.zeros((1, d_mid_p), jnp.float32).at[0, :d_mid].set(b2.astype(jnp.float32))
    b3_p = jnp.zeros((1, d_out_p), jnp.float32).at[0, :out_dim].set(b3.astype(jnp.float32))
    return (w1_p, b1_p, w2_p, b2_p, w3_p, b3_p)


@functools.partial(jax.jit, static_argnames=("out_dim",))
def _ebm_forward_padded(z, w1_p, b1_p, w2_p, b2_p, w3_p, b3_p, *, out_dim):
    """Forward with pre-padded parameters.  z: (B, latent, 1, 1) or (B, latent)."""
    zsq = z.reshape(z.shape[0], -1).astype(jnp.float32)   # z.squeeze() semantics
    B, d_in = zsq.shape
    d_in_p = w1_p.shape[0]
    d_out_p = w3_p.shape[1]

    # Batch tiling: one full-batch step when small; 256-row parallel tiles when big.
    b_small = _round_up(B, SUBLANE)
    if b_small <= _MAX_SINGLE_STEP_ROWS:
        tb = b_small
    else:
        tb = _BATCH_TILE
    b_p = _round_up(B, tb)
    n_steps = b_p // tb

    # Only the (tiny) activation tensor is padded per call.
    z_p = jnp.zeros((b_p, d_in_p), jnp.float32).at[:B, :d_in].set(zsq)

    def wspec(arr):
        # Grid-invariant operand: same block every step.  For multi-step grids,
        # single-buffer it (no point double-buffering an invariant block).
        if n_steps > 1:
            return pl.BlockSpec(arr.shape, lambda i: (0, 0),
                                pipeline_mode=pl.Buffered(1))
        return pl.BlockSpec(arr.shape, lambda i: (0, 0))

    out_p = pl.pallas_call(
        _ebm_mlp_kernel,
        out_shape=jax.ShapeDtypeStruct((b_p, d_out_p), jnp.float32),
        grid=(n_steps,),
        in_specs=[
            pl.BlockSpec((tb, d_in_p), lambda i: (i, 0)),
            wspec(w1_p), wspec(b1_p),
            wspec(w2_p), wspec(b2_p),
            wspec(w3_p), wspec(b3_p),
        ],
        out_specs=pl.BlockSpec((tb, d_out_p), lambda i: (i, 0)),
        compiler_params=pltpu.CompilerParams(
            dimension_semantics=(("parallel",) if n_steps > 1 else ("arbitrary",))),
    )(z_p, w1_p, b1_p, w2_p, b2_p, w3_p, b3_p)

    # Strip padding, then .view(-1, ebm_out_dim, 1, 1)
    return out_p[:B, :out_dim].reshape(-1, out_dim, 1, 1)


class EBMPriorPallas:
    """Pallas equivalent of EBM_Prior.forward with padding hoisted to init."""

    def __init__(self, w1, b1, w2, b2, w3, b3):
        self.out_dim = int(w3.shape[0])
        self.params = prepare_ebm_prior_params(w1, b1, w2, b2, w3, b3)

    def __call__(self, z):
        return _ebm_forward_padded(z, *self.params, out_dim=self.out_dim)


def _reference(z, w1, b1, w2, b2, w3, b3):
    """Pure-JAX f32 reference matching the PyTorch module semantics."""
    x = z.reshape(z.shape[0], -1)
    x = x @ w1.T + b1
    x = jax.nn.gelu(x, approximate=False)
    x = x @ w2.T + b2
    x = jax.nn.gelu(x, approximate=False)
    x = x @ w3.T + b3
    return x.reshape(-1, w3.shape[0], 1, 1)


if __name__ == "__main__":
    key = jax.random.PRNGKey(0)
    B, latent_dim, ebm_middle_dim, ebm_out_dim = 16, 32, 64, 1

    kz, kw1, kb1, kw2, kb2, kw3, kb3 = jax.random.split(key, 7)
    z = jax.random.normal(kz, (B, latent_dim, 1, 1), jnp.float32)

    # Synthetic parameters in nn.Linear layout (out, in), ~1/sqrt(fan_in) scale.
    s1 = 1.0 / jnp.sqrt(latent_dim)
    s2 = 1.0 / jnp.sqrt(ebm_middle_dim)
    w1 = jax.random.uniform(kw1, (ebm_middle_dim, latent_dim), jnp.float32, -1.0, 1.0) * s1
    b1 = jax.random.uniform(kb1, (ebm_middle_dim,), jnp.float32, -1.0, 1.0) * s1
    w2 = jax.random.uniform(kw2, (ebm_middle_dim, ebm_middle_dim), jnp.float32, -1.0, 1.0) * s2
    b2 = jax.random.uniform(kb2, (ebm_middle_dim,), jnp.float32, -1.0, 1.0) * s2
    w3 = jax.random.uniform(kw3, (ebm_out_dim, ebm_middle_dim), jnp.float32, -1.0, 1.0) * s2
    b3 = jax.random.uniform(kb3, (ebm_out_dim,), jnp.float32, -1.0, 1.0) * s2

    model = EBMPriorPallas(w1, b1, w2, b2, w3, b3)   # params padded once, here
    out = model(z)
    out = jax.block_until_ready(out)
    assert out.shape == (B, ebm_out_dim, 1, 1), out.shape

    ref = _reference(z, w1, b1, w2, b2, w3, b3)
    err = float(jnp.max(jnp.abs(out - ref)))
    # Tolerance covers bf16 matmul operands (f32 accumulation) vs. the f32
    # reference; the in-kernel erf polynomial contributes < 1e-6.
    assert err < 3e-2, f"mismatch vs reference: max abs err = {err}"

    print("KERNEL_OK")
</pallas_src>

<mosaic_0001>
module attributes {stable_mosaic.version = 11 : i64} {
  func.func @_ebm_mlp_kernel(%arg0: i32, %arg1: memref<16x128xf32, #tpu.memory_space<vmem>>, %arg2: memref<128x128xbf16, #tpu.memory_space<vmem>>, %arg3: memref<1x128xf32, #tpu.memory_space<vmem>>, %arg4: memref<128x128xbf16, #tpu.memory_space<vmem>>, %arg5: memref<1x128xf32, #tpu.memory_space<vmem>>, %arg6: memref<128x128xbf16, #tpu.memory_space<vmem>>, %arg7: memref<1x128xf32, #tpu.memory_space<vmem>>, %arg8: memref<16x128xf32, #tpu.memory_space<vmem>>) attributes {dimension_semantics = [#tpu.dimension_semantics<arbitrary>], iteration_bounds = array<i64: 1>, scalar_prefetch = 0 : i64, scratch_operands = 0 : i64, tpu.core_type = #tpu.core_type<tc>, window_params = [{transform_indices = @transform_0, window_bounds = array<i64: 16, 128>}, {pipeline_mode = #tpu.pipeline_mode<synchronous>, transform_indices = @transform_1, window_bounds = array<i64: 128, 128>}, {pipeline_mode = #tpu.pipeline_mode<synchronous>, transform_indices = @transform_2, window_bounds = array<i64: 1, 128>}, {pipeline_mode = #tpu.pipeline_mode<synchronous>, transform_indices = @transform_3, window_bounds = array<i64: 128, 128>}, {pipeline_mode = #tpu.pipeline_mode<synchronous>, transform_indices = @transform_4, window_bounds = array<i64: 1, 128>}, {pipeline_mode = #tpu.pipeline_mode<synchronous>, transform_indices = @transform_5, window_bounds = array<i64: 128, 128>}, {pipeline_mode = #tpu.pipeline_mode<synchronous>, transform_indices = @transform_6, window_bounds = array<i64: 1, 128>}, {transform_indices = @transform_7, window_bounds = array<i64: 16, 128>}]} {
    %c0 = arith.constant 0 : index
    %c0_0 = arith.constant 0 : index
    %0 = vector.load %arg1[%c0, %c0_0] : memref<16x128xf32, #tpu.memory_space<vmem>>, vector<16x128xf32>
    %1 = arith.truncf %0 : vector<16x128xf32> to vector<16x128xbf16>
    %c0_1 = arith.constant 0 : index
    %c0_2 = arith.constant 0 : index
    %2 = vector.load %arg2[%c0_1, %c0_2] : memref<128x128xbf16, #tpu.memory_space<vmem>>, vector<128x128xbf16>
    %cst = arith.constant dense<0.000000e+00> : vector<16x128xf32>
    %3 = tpu.matmul %1, %2, %cst {dimension_numbers = #tpu.dot_dimension_numbers<[1], [0], [0], [1], [0, 0, 1, 1], [], []>} : vector<16x128xbf16>, vector<128x128xbf16>, vector<16x128xf32> -> vector<16x128xf32>
    %c0_3 = arith.constant 0 : index
    %c0_4 = arith.constant 0 : index
    %4 = vector.load %arg3[%c0_3, %c0_4] : memref<1x128xf32, #tpu.memory_space<vmem>>, vector<1x128xf32>
    %5 = vector.broadcast %4 : vector<1x128xf32> to vector<16x128xf32>
    %6 = arith.addf %3, %5 : vector<16x128xf32>
    %cst_5 = arith.constant 5.000000e-01 : f32
    %7 = vector.broadcast %cst_5 : f32 to vector<16x128xf32>
    %8 = arith.mulf %7, %6 : vector<16x128xf32>
    %cst_6 = arith.constant 0.707106769 : f32
    %9 = vector.broadcast %cst_6 : f32 to vector<16x128xf32>
    %10 = arith.mulf %6, %9 : vector<16x128xf32>
    %11 = math.absf %10 : vector<16x128xf32>
    %cst_7 = arith.constant 0.327591091 : f32
    %12 = vector.broadcast %cst_7 : f32 to vector<16x128xf32>
    %13 = arith.mulf %12, %11 : vector<16x128xf32>
    %cst_8 = arith.constant 1.000000e+00 : f32
    %14 = vector.broadcast %cst_8 : f32 to vector<16x128xf32>
    %15 = arith.addf %14, %13 : vector<16x128xf32>
    %cst_9 = arith.constant 1.000000e+00 : f32
    %16 = vector.broadcast %cst_9 : f32 to vector<16x128xf32>
    %17 = arith.divf %16, %15 : vector<16x128xf32>
    %cst_10 = arith.constant 1.06140542 : f32
    %18 = vector.broadcast %cst_10 : f32 to vector<16x128xf32>
    %19 = arith.mulf %18, %17 : vector<16x128xf32>
    %cst_11 = arith.constant -1.45315206 : f32
    %20 = vector.broadcast %cst_11 : f32 to vector<16x128xf32>
    %21 = arith.addf %19, %20 : vector<16x128xf32>
    %22 = arith.mulf %21, %17 : vector<16x128xf32>
    %cst_12 = arith.constant 1.42141378 : f32
    %23 = vector.broadcast %cst_12 : f32 to vector<16x128xf32>
    %24 = arith.addf %22, %23 : vector<16x128xf32>
    %25 = arith.mulf %24, %17 : vector<16x128xf32>
    %cst_13 = arith.constant -0.284496725 : f32
    %26 = vector.broadcast %cst_13 : f32 to vector<16x128xf32>
    %27 = arith.addf %25, %26 : vector<16x128xf32>
    %28 = arith.mulf %27, %17 : vector<16x128xf32>
    %cst_14 = arith.constant 0.254829586 : f32
    %29 = vector.broadcast %cst_14 : f32 to vector<16x128xf32>
    %30 = arith.addf %28, %29 : vector<16x128xf32>
    %31 = arith.mulf %30, %17 : vector<16x128xf32>
    %cst_15 = arith.constant 0.000000e+00 : f32
    %32 = vector.broadcast %cst_15 : f32 to vector<16x128xf32>
    %33 = arith.subf %32, %11 : vector<16x128xf32>
    %34 = arith.mulf %33, %11 : vector<16x128xf32>
    %35 = math.exp %34 : vector<16x128xf32>
    %36 = arith.mulf %31, %35 : vector<16x128xf32>
    %cst_16 = arith.constant 1.000000e+00 : f32
    %37 = vector.broadcast %cst_16 : f32 to vector<16x128xf32>
    %38 = arith.subf %37, %36 : vector<16x128xf32>
    %cst_17 = arith.constant 0.000000e+00 : f32
    %39 = vector.broadcast %cst_17 : f32 to vector<16x128xf32>
    %40 = arith.cmpf olt, %10, %39 : vector<16x128xf32>
    %cst_18 = arith.constant 0.000000e+00 : f32
    %41 = vector.broadcast %cst_18 : f32 to vector<16x128xf32>
    %42 = arith.subf %41, %38 : vector<16x128xf32>
    %43 = arith.select %40, %42, %38 : vector<16x128xi1>, vector<16x128xf32>
    %cst_19 = arith.constant 1.000000e+00 : f32
    %44 = vector.broadcast %cst_19 : f32 to vector<16x128xf32>
    %45 = arith.addf %44, %43 : vector<16x128xf32>
    %46 = arith.mulf %8, %45 : vector<16x128xf32>
    %47 = arith.truncf %46 : vector<16x128xf32> to vector<16x128xbf16>
    %c0_20 = arith.constant 0 : index
    %c0_21 = arith.constant 0 : index
    %48 = vector.load %arg4[%c0_20, %c0_21] : memref<128x128xbf16, #tpu.memory_space<vmem>>, vector<128x128xbf16>
    %cst_22 = arith.constant dense<0.000000e+00> : vector<16x128xf32>
    %49 = tpu.matmul %47, %48, %cst_22 {dimension_numbers = #tpu.dot_dimension_numbers<[1], [0], [0], [1], [0, 0, 1, 1], [], []>} : vector<16x128xbf16>, vector<128x128xbf16>, vector<16x128xf32> -> vector<16x128xf32>
    %c0_23 = arith.constant 0 : index
    %c0_24 = arith.constant 0 : index
    %50 = vector.load %arg5[%c0_23, %c0_24] : memref<1x128xf32, #tpu.memory_space<vmem>>, vector<1x128xf32>
    %51 = vector.broadcast %50 : vector<1x128xf32> to vector<16x128xf32>
    %52 = arith.addf %49, %51 : vector<16x128xf32>
    %cst_25 = arith.constant 5.000000e-01 : f32
    %53 = vector.broadcast %cst_25 : f32 to vector<16x128xf32>
    %54 = arith.mulf %53, %52 : vector<16x128xf32>
    %cst_26 = arith.constant 0.707106769 : f32
    %55 = vector.broadcast %cst_26 : f32 to vector<16x128xf32>
    %56 = arith.mulf %52, %55 : vector<16x128xf32>
    %57 = math.absf %56 : vector<16x128xf32>
    %cst_27 = arith.constant 0.327591091 : f32
    %58 = vector.broadcast %cst_27 : f32 to vector<16x128xf32>
    %59 = arith.mulf %58, %57 : vector<16x128xf32>
    %cst_28 = arith.constant 1.000000e+00 : f32
    %60 = vector.broadcast %cst_28 : f32 to vector<16x128xf32>
    %61 = arith.addf %60, %59 : vector<16x128xf32>
    %cst_29 = arith.constant 1.000000e+00 : f32
    %62 = vector.broadcast %cst_29 : f32 to vector<16x128xf32>
    %63 = arith.divf %62, %61 : vector<16x128xf32>
    %cst_30 = arith.constant 1.06140542 : f32
    %64 = vector.broadcast %cst_30 : f32 to vector<16x128xf32>
    %65 = arith.mulf %64, %63 : vector<16x128xf32>
    %cst_31 = arith.constant -1.45315206 : f32
    %66 = vector.broadcast %cst_31 : f32 to vector<16x128xf32>
    %67 = arith.addf %65, %66 : vector<16x128xf32>
    %68 = arith.mulf %67, %63 : vector<16x128xf32>
    %cst_32 = arith.constant 1.42141378 : f32
    %69 = vector.broadcast %cst_32 : f32 to vector<16x128xf32>
    %70 = arith.addf %68, %69 : vector<16x128xf32>
    %71 = arith.mulf %70, %63 : vector<16x128xf32>
    %cst_33 = arith.constant -0.284496725 : f32
    %72 = vector.broadcast %cst_33 : f32 to vector<16x128xf32>
    %73 = arith.addf %71, %72 : vector<16x128xf32>
    %74 = arith.mulf %73, %63 : vector<16x128xf32>
    %cst_34 = arith.constant 0.254829586 : f32
    %75 = vector.broadcast %cst_34 : f32 to vector<16x128xf32>
    %76 = arith.addf %74, %75 : vector<16x128xf32>
    %77 = arith.mulf %76, %63 : vector<16x128xf32>
    %cst_35 = arith.constant 0.000000e+00 : f32
    %78 = vector.broadcast %cst_35 : f32 to vector<16x128xf32>
    %79 = arith.subf %78, %57 : vector<16x128xf32>
    %80 = arith.mulf %79, %57 : vector<16x128xf32>
    %81 = math.exp %80 : vector<16x128xf32>
    %82 = arith.mulf %77, %81 : vector<16x128xf32>
    %cst_36 = arith.constant 1.000000e+00 : f32
    %83 = vector.broadcast %cst_36 : f32 to vector<16x128xf32>
    %84 = arith.subf %83, %82 : vector<16x128xf32>
    %cst_37 = arith.constant 0.000000e+00 : f32
    %85 = vector.broadcast %cst_37 : f32 to vector<16x128xf32>
    %86 = arith.cmpf olt, %56, %85 : vector<16x128xf32>
    %cst_38 = arith.constant 0.000000e+00 : f32
    %87 = vector.broadcast %cst_38 : f32 to vector<16x128xf32>
    %88 = arith.subf %87, %84 : vector<16x128xf32>
    %89 = arith.select %86, %88, %84 : vector<16x128xi1>, vector<16x128xf32>
    %cst_39 = arith.constant 1.000000e+00 : f32
    %90 = vector.broadcast %cst_39 : f32 to vector<16x128xf32>
    %91 = arith.addf %90, %89 : vector<16x128xf32>
    %92 = arith.mulf %54, %91 : vector<16x128xf32>
    %93 = arith.truncf %92 : vector<16x128xf32> to vector<16x128xbf16>
    %c0_40 = arith.constant 0 : index
    %c0_41 = arith.constant 0 : index
    %94 = vector.load %arg6[%c0_40, %c0_41] : memref<128x128xbf16, #tpu.memory_space<vmem>>, vector<128x128xbf16>
    %cst_42 = arith.constant dense<0.000000e+00> : vector<16x128xf32>
    %95 = tpu.matmul %93, %94, %cst_42 {dimension_numbers = #tpu.dot_dimension_numbers<[1], [0], [0], [1], [0, 0, 1, 1], [], []>} : vector<16x128xbf16>, vector<128x128xbf16>, vector<16x128xf32> -> vector<16x128xf32>
    %c0_43 = arith.constant 0 : index
    %c0_44 = arith.constant 0 : index
    %96 = vector.load %arg7[%c0_43, %c0_44] : memref<1x128xf32, #tpu.memory_space<vmem>>, vector<1x128xf32>
    %97 = vector.broadcast %96 : vector<1x128xf32> to vector<16x128xf32>
    %98 = arith.addf %95, %97 : vector<16x128xf32>
    %c0_45 = arith.constant 0 : index
    %c0_46 = arith.constant 0 : index
    %99 = vector.load %arg8[%c0_45, %c0_46] : memref<16x128xf32, #tpu.memory_space<vmem>>, vector<16x128xf32>
    tpu.vector_store %arg8[%c0_45, %c0_46], %98 {strides = array<i32>} : memref<16x128xf32, #tpu.memory_space<vmem>>, vector<16x128xf32>,
    return
  }
  func.func @transform_0(%arg0: i32) -> (i32, i32) {
    %c0_i32 = arith.constant 0 : i32
    %c0_i32_0 = arith.constant 0 : i32
    return %arg0, %c0_i32 : i32, i32
  }
  func.func @transform_1(%arg0: i32) -> (i32, i32) {
    %c0_i32 = arith.constant 0 : i32
    %c0_i32_0 = arith.constant 0 : i32
    %c0_i32_1 = arith.constant 0 : i32
    return %c0_i32, %c0_i32_0 : i32, i32
  }
  func.func @transform_2(%arg0: i32) -> (i32, i32) {
    %c0_i32 = arith.constant 0 : i32
    %c0_i32_0 = arith.constant 0 : i32
    %c0_i32_1 = arith.constant 0 : i32
    return %c0_i32, %c0_i32_0 : i32, i32
  }
  func.func @transform_3(%arg0: i32) -> (i32, i32) {
    %c0_i32 = arith.constant 0 : i32
    %c0_i32_0 = arith.constant 0 : i32
    %c0_i32_1 = arith.constant 0 : i32
    return %c0_i32, %c0_i32_0 : i32, i32
  }
  func.func @transform_4(%arg0: i32) -> (i32, i32) {
    %c0_i32 = arith.constant 0 : i32
    %c0_i32_0 = arith.constant 0 : i32
    %c0_i32_1 = arith.constant 0 : i32
    return %c0_i32, %c0_i32_0 : i32, i32
  }
  func.func @transform_5(%arg0: i32) -> (i32, i32) {
    %c0_i32 = arith.constant 0 : i32
    %c0_i32_0 = arith.constant 0 : i32
    %c0_i32_1 = arith.constant 0 : i32
    return %c0_i32, %c0_i32_0 : i32, i32
  }
  func.func @transform_6(%arg0: i32) -> (i32, i32) {
    %c0_i32 = arith.constant 0 : i32
    %c0_i32_0 = arith.constant 0 : i32
    %c0_i32_1 = arith.constant 0 : i32
    return %c0_i32, %c0_i32_0 : i32, i32
  }
  func.func @transform_7(%arg0: i32) -> (i32, i32) {
    %c0_i32 = arith.constant 0 : i32
    %c0_i32_0 = arith.constant 0 : i32
    return %arg0, %c0_i32 : i32, i32
  }
}

</mosaic_0001>

<bundles_post_ra>
// kernel: _ebm_forward_padded.1
= control target key start
LH: loop header
LB: loop body
LE: loop exit
PB: predicated region body
PF: predicated region fallthrough
CT: control target
= control target key end

     0   :  { %12 = vsyncpa [#allocation3], 0  ;;  %s865_s0 = inlined_call_operand.vmem [shape: f32[16,128], index: 0, kind: input, shape index: {}]   ;;  %s866_s1 = inlined_call_operand.vmem [shape: bf16[128,128], index: 1, kind: input, shape index: {}]   ;;  %s867_s2 = inlined_call_operand.vmem [shape: f32[1,128], index: 2, kind: input, shape index: {}]   ;;  %s868_s3 = inlined_call_operand.hbm [shape: bf16[128,128], index: 3, kind: input, shape index: {}]   ;;  %s869_s4 = inlined_call_operand.vmem [shape: f32[1,128], index: 4, kind: input, shape index: {}]   ;;  %s870_s5 = inlined_call_operand.hbm [shape: bf16[128,128], index: 5, kind: input, shape index: {}]   ;;  %s871_s6 = inlined_call_operand.vmem [shape: f32[1,128], index: 6, kind: input, shape index: {}]   ;;  %s872_s7 = inlined_call_operand.vmem [shape: f32[16,128], index: 7, kind: output, shape index: {}]  }
   0x1   :  { %13 = vsyncpa [#allocation5], 0  ;;  %s720_s24 = smov [#allocation2]   ;;  %s672_s28 = scalar_lea.hbm %s868_s3, 1024 }
   0x2   :  { %s25_s25 = sshll.u32 %s720_s24, 4  ;;  %p673_p0 = scmp.ne.s32.totalorder %s868_s3, %s672_s28  ;;  %s26_s25 = int_to_ptr.vmem [resolvable:$true] %s25_s25 }
   0x3   :  { %p676_p1 = scmp.lt.u32.totalorder %s672_s28, %s868_s3 }
   0x5   :  { %p678_p2 = pnand %p676_p1, %p673_p0 }
   0x7   :  { %681 = shalt.err (!%p678_p2)
}
   0x8   :  { %s682_s10 = scalar_lea.vmem %s26_s25, 1024  ;;  %p687_p4 = scmp.lt.s32.totalorder %s26_s25, %s26_s25 }
   0x9   :  { %p683_p3 = scmp.ne.s32.totalorder %s26_s25, %s682_s10  ;;  %p688_p5 = scmp.lt.s32.totalorder %s682_s10, %s682_s10 }
   0xb   :  { %p689_p6 = por %p688_p5, %p687_p4 }
   0xd   :  { %p690_p7 = pnand %p689_p6, %p683_p3 }
   0xf   :  { %693 = shalt.err (!%p690_p7)
}
  0x10   :  { %s721_s11 = smov 64   ;;  %s722_s12 = smov 4  }
  0x11   :  { %31 = dma.hbm_to_vmem [thread:$0]  %s868_s3, 1024, %s26_s25, [#allocation3], %s721_s11, %s721_s11, %s722_s12  }
  0x12   :  { %s723_s15 = smov [#allocation4]   ;;  %s694_s19 = scalar_lea.hbm %s870_s5, 1024 }
  0x13   :  { %s39_s16 = sshll.u32 %s723_s15, 4  ;;  %p695_p8 = scmp.ne.s32.totalorder %s870_s5, %s694_s19  ;;  %s40_s16 = int_to_ptr.vmem [resolvable:$true] %s39_s16 }
  0x14   :  { %p698_p9 = scmp.lt.u32.totalorder %s694_s19, %s870_s5 }
  0x16   :  { %p700_p10 = pnand %p698_p9, %p695_p8 }
  0x18   :  { %703 = shalt.err (!%p700_p10)
}
  0x19   :  { %s704_s24 = scalar_lea.vmem %s40_s16, 1024  ;;  %p709_p12 = scmp.lt.s32.totalorder %s40_s16, %s40_s16 }
  0x1a   :  { %p705_p11 = scmp.ne.s32.totalorder %s40_s16, %s704_s24  ;;  %p710_p13 = scmp.lt.s32.totalorder %s704_s24, %s704_s24 }
  0x1c   :  { %p711_p0 = por %p710_p13, %p709_p12 }
  0x1e   :  { %p712_p1 = pnand %p711_p0, %p705_p11 }
  0x20   :  { %715 = shalt.err (!%p712_p1)
}
  0x21   :  { %45 = dma.hbm_to_vmem [thread:$0]  %s870_s5, 1024, %s40_s16, [#allocation5], %s721_s11, %s721_s11, %s722_s12  }
  0x22   :  { %716 = dma.done.wait [#allocation3], 1024  }
  0x23   :  { %717 = vsyncadd [#allocation3], 4294966272 }
  0x24   :  { %718 = dma.done.wait [#allocation5], 1024  }
  0x25   :  { %719 = vsyncadd [#allocation5], 4294966272  ;;  %v724_v0 = vmov 0.0   ;;  %vm725_vm0 = vmmov 0   ;;  %v632_v1 = vld [vmem:[%s866_s1] sm:$0xff]   ;;  %v633_v2 = vld [vmem:[%s866_s1 + $0x8] sm:$0xff]  }
  0x26   :  { %566 = vmatprep.subr.bf16.mxu0 %v724_v0  ;;  %582 = vmatprep.mubr.msk.bf16.mxu0 %vm725_vm0, %v724_v0  ;;  %v634_v3 = vld [vmem:[%s866_s1 + $0x10] sm:$0xff]   ;;  %v635_v4 = vld [vmem:[%s866_s1 + $0x18] sm:$0xff]   ;;  %v636_v5 = vld [vmem:[%s866_s1 + $0x20] sm:$0xff]  }
  0x27   :  { %586 = vmatprep.subr.bf16.mxu1 %v724_v0  ;;  %602 = vmatprep.mubr.msk.bf16.mxu1 %vm725_vm0, %v724_v0  ;;  %v637_v6 = vld [vmem:[%s866_s1 + $0x28] sm:$0xff]   ;;  %v638_v7 = vld [vmem:[%s866_s1 + $0x30] sm:$0xff]   ;;  %v639_v8 = vld [vmem:[%s866_s1 + $0x38] sm:$0xff]  }
  0x28   :  { %567 = vmatpush3.bf16.msra.mxu0 %v632_v1  ;;  %v55_v9 = vld [vmem:[%s865_s0] sm:$0xff]  ;;  %v56_v10 = vld [vmem:[%s865_s0 + $0x8] sm:$0xff]  ;;  %v642_v14 = vld [vmem:[#allocation2 + $0x10] sm:$0xff]  }
  0x29   :  { %568 = vmatprep.subr.bf16.mxu0 %v724_v0  ;;  %v57_v11 = vpack.c.bf16 %v56_v10, %v55_v9  ;;  %v640_v12 = vld [vmem:[#allocation2] sm:$0xff]   ;;  %v641_v13 = vld [vmem:[#allocation2 + $0x8] sm:$0xff]   ;;  %v643_v15 = vld [vmem:[#allocation2 + $0x18] sm:$0xff]  }
  0x2a   :  { %587 = vmatpush3.bf16.msra.mxu1 %v640_v12  ;;  %v644_v16 = vld [vmem:[#allocation2 + $0x20] sm:$0xff]   ;;  %v645_v17 = vld [vmem:[#allocation2 + $0x28] sm:$0xff]   ;;  %v646_v18 = vld [vmem:[#allocation2 + $0x30] sm:$0xff]  }
  0x2b   :  { %588 = vmatprep.subr.bf16.mxu1 %v724_v0  ;;  %v647_v19 = vld [vmem:[#allocation2 + $0x38] sm:$0xff]   ;;  %v512_v20 = vld [vmem:[%s867_s2] ss:$0 sm:$0xff] }
  0x2c   :  { %569 = vmatpush3.bf16.msra.mxu0 %v633_v2 }
  0x2d   :  { %570 = vmatprep.subr.bf16.mxu0 %v724_v0 }
  0x2e   :  { %589 = vmatpush3.bf16.msra.mxu1 %v641_v13 }
  0x2f   :  { %590 = vmatprep.subr.bf16.mxu1 %v724_v0 }
  0x30   :  { %571 = vmatpush3.bf16.msra.mxu0 %v634_v3 }
  0x31   :  { %572 = vmatprep.subr.bf16.mxu0 %v724_v0 }
  0x32   :  { %591 = vmatpush3.bf16.msra.mxu1 %v642_v14 }
  0x33   :  { %592 = vmatprep.subr.bf16.mxu1 %v724_v0 }
  0x34   :  { %573 = vmatpush3.bf16.msra.mxu0 %v635_v4 }
  0x35   :  { %574 = vmatprep.subr.bf16.mxu0 %v724_v0 }
  0x36   :  { %593 = vmatpush3.bf16.msra.mxu1 %v643_v15  ;;  %v648_v15 = vld [vmem:[#allocation4] sm:$0xff]  }
  0x37   :  { %594 = vmatprep.subr.bf16.mxu1 %v724_v0 }
  0x38   :  { %575 = vmatpush3.bf16.msra.mxu0 %v636_v5 }
  0x39   :  { %576 = vmatprep.subr.bf16.mxu0 %v724_v0 }
  0x3a   :  { %595 = vmatpush3.bf16.msra.mxu1 %v644_v16  ;;  %v649_v16 = vld [vmem:[#allocation4 + $0x8] sm:$0xff]  }
  0x3b   :  { %596 = vmatprep.subr.bf16.mxu1 %v724_v0 }
  0x3c   :  { %577 = vmatpush3.bf16.msra.mxu0 %v637_v6 }
  0x3d   :  { %578 = vmatprep.subr.bf16.mxu0 %v724_v0 }
  0x3e   :  { %597 = vmatpush3.bf16.msra.mxu1 %v645_v17  ;;  %v650_v17 = vld [vmem:[#allocation4 + $0x10] sm:$0xff]  }
  0x3f   :  { %598 = vmatprep.subr.bf16.mxu1 %v724_v0 }
  0x40   :  { %579 = vmatpush3.bf16.msra.mxu0 %v638_v7 }
  0x41   :  { %580 = vmatprep.subr.bf16.mxu0 %v724_v0 }
  0x42   :  { %599 = vmatpush3.bf16.msra.mxu1 %v646_v18  ;;  %v651_v18 = vld [vmem:[#allocation4 + $0x18] sm:$0xff]  }
  0x43   :  { %600 = vmatprep.subr.bf16.mxu1 %v724_v0 }
  0x44   :  { %581 = vmatpush3.bf16.msra.mxu0 %v639_v8 }
  0x45   :  { %606 = vmatprep.subr.bf16.mxu0 %v724_v0 }
  0x46   :  { %601 = vmatpush3.bf16.msra.mxu1 %v647_v19  ;;  %v652_v19 = vld [vmem:[#allocation4 + $0x20] sm:$0xff]  }
  0x47   :  { %583 = vmatmul.mubr.bf16.vlgmr.msra.gmra.mrb[0].mxu0 %v57_v11 }
  0x48   :  { %622 = vmatprep.mubr.msk.bf16.mxu0 %vm725_vm0, %v724_v0  ;;  %607 = vmatpush3.bf16.msra.mxu0 %v648_v15 }
  0x49   :  { %608 = vmatprep.subr.bf16.mxu0 %v724_v0 }
  0x4c   :  { %609 = vmatpush3.bf16.msra.mxu0 %v649_v16 }
  0x4d   :  { %610 = vmatprep.subr.bf16.mxu0 %v724_v0 }
  0x50   :  { %611 = vmatpush3.bf16.msra.mxu0 %v650_v17  ;;  %v530_v17 = vld [vmem:[%s871_s6] ss:$0 sm:$0xff] }
  0x51   :  { %612 = vmatprep.subr.bf16.mxu0 %v724_v0 }
  0x54   :  { %613 = vmatpush3.bf16.msra.mxu0 %v651_v18 }
  0x55   :  { %614 = vmatprep.subr.bf16.mxu0 %v724_v0 }
  0x58   :  { %615 = vmatpush3.bf16.msra.mxu0 %v652_v19 }
  0x59   :  { %616 = vmatprep.subr.bf16.mxu0 %v724_v0 }
 0x11a   :  { %v163_v21 = vpop.f32.mrb[0].mxu0 }
 0x11b   :  { %v164_v22 = vadd.f32 %v512_v20, %v163_v21  ;;  %v584_v23 = vpop.f32.mrb[1].mxu0  ;;  %v654_v21 = vld [vmem:[#allocation4 + $0x30] sm:$0xff]  }
 0x11c   :  { %v166_v24 = vpop.f32.mrb[2].mxu0  ;;  %v521_v23 = vld [vmem:[%s869_s4] ss:$0 sm:$0xff] }
 0x11d   :  { %v172_v25 = vmul.f32 0.70710677, %v164_v22  ;;  %v167_v26 = vadd.f32 %v512_v20, %v166_v24  ;;  %v585_v27 = vpop.f32.mrb[3].mxu0  ;;  %v170_v9 = vmul.f32 0.5, %v164_v22  ;;  %v653_v20 = vld [vmem:[#allocation4 + $0x28] sm:$0xff]   ;;  %v655_v22 = vld [vmem:[#allocation4 + $0x38] sm:$0xff]  }
 0x11e   :  { %617 = vmatpush3.bf16.msra.mxu0 %v653_v20 }
 0x11f   :  { %v174_v28 = vand.u32 2147483647, %v172_v25  ;;  %v173_v29 = vmul.f32 0.70710677, %v167_v26  ;;  %vm214_vm1 = vcmp.lt.f32.partialorder %v172_v25, 0.0  ;;  %v171_v10 = vmul.f32 0.5, %v167_v26  ;;  %618 = vmatprep.subr.bf16.mxu0 %v724_v0 }
 0x121   :  { %v176_v30 = vmul.f32 0.3275911, %v174_v28  ;;  %v175_v31 = vand.u32 2147483647, %v173_v29  ;;  %v202_v35 = vsub.f32 0.0, %v174_v28  ;;  %vm215_vm2 = vcmp.lt.f32.partialorder %v173_v29, 0.0 }
 0x122   :  { %619 = vmatpush3.bf16.msra.mxu0 %v654_v21 }
 0x123   :  { %v178_v32 = vadd.f32 1.0, %v176_v30  ;;  %v177_v33 = vmul.f32 0.3275911, %v175_v31  ;;  %v203_v36 = vsub.f32 0.0, %v175_v31  ;;  %v204_v38 = vmul.f32 %v202_v35, %v174_v28  ;;  %620 = vmatprep.subr.bf16.mxu0 %v724_v0 }
 0x125   :  { %656 = vrcp.f32 %v178_v32  ;;  %v179_v34 = vadd.f32 1.0, %v177_v33  ;;  %v205_v42 = vmul.f32 %v203_v36, %v175_v31  ;;  %v206_v43 = vmul.f32 1.442695, %v204_v38 }
 0x126   :  { %621 = vmatpush3.bf16.msra.mxu0 %v655_v22 }
 0x127   :  { %658 = vrcp.f32 %v179_v34  ;;  %v208_v48 = vmul.f32 1.442695, %v205_v42 }
 0x128   :  { %660 = vpow2.f32 %v206_v43 }
 0x129   :  { %662 = vpow2.f32 %v208_v48 }
 0x12f   :  { %v657_v37 = vpop.eup %656 }
 0x130   :  { %v184_v39 = vmul.f32 1.0614054, %v657_v37 }
 0x131   :  { %v659_v40 = vpop.eup %658 }
 0x132   :  { %v186_v41 = vadd.f32 -1.4531521, %v184_v39  ;;  %v185_v44 = vmul.f32 1.0614054, %v659_v40  ;;  %v661_v59 = vpop.eup %660 }
 0x133   :  { %v663_v63 = vpop.eup %662 }
 0x134   :  { %v188_v45 = vmul.f32 %v657_v37, %v186_v41  ;;  %v187_v46 = vadd.f32 -1.4531521, %v185_v44 }
 0x136   :  { %v190_v47 = vadd.f32 1.4214138, %v188_v45  ;;  %v189_v49 = vmul.f32 %v659_v40, %v187_v46 }
 0x138   :  { %v192_v50 = vmul.f32 %v657_v37, %v190_v47  ;;  %v191_v51 = vadd.f32 1.4214138, %v189_v49 }
 0x13a   :  { %v194_v52 = vadd.f32 -0.28449672, %v192_v50  ;;  %v193_v53 = vmul.f32 %v659_v40, %v191_v51 }
 0x13c   :  { %v196_v54 = vmul.f32 %v657_v37, %v194_v52  ;;  %v195_v55 = vadd.f32 -0.28449672, %v193_v53 }
 0x13e   :  { %v198_v56 = vadd.f32 0.2548296, %v196_v54  ;;  %v197_v57 = vmul.f32 %v659_v40, %v195_v55 }
 0x140   :  { %v200_v58 = vmul.f32 %v657_v37, %v198_v56  ;;  %v199_v60 = vadd.f32 0.2548296, %v197_v57 }
 0x142   :  { %v210_v61 = vmul.f32 %v661_v59, %v200_v58  ;;  %v201_v62 = vmul.f32 %v659_v40, %v199_v60 }
 0x144   :  { %v212_v1 = vsub.f32 1.0, %v210_v61  ;;  %v211_v2 = vmul.f32 %v663_v63, %v201_v62 }
 0x146   :  { %v216_v3 = vsub.f32 0.0, %v212_v1  ;;  %v213_v4 = vsub.f32 1.0, %v211_v2 }
 0x148   :  { %v218_v5 = vsel %vm214_vm1, %v216_v3, %v212_v1  ;;  %v217_v6 = vsub.f32 0.0, %v213_v4 }
 0x149   :  { %v220_v7 = vadd.f32 1.0, %v218_v5 }
 0x14a   :  { %v219_v8 = vsel %vm215_vm2, %v217_v6, %v213_v4 }
 0x14b   :  { %v221_v11 = vadd.f32 1.0, %v219_v8  ;;  %v222_v12 = vmul.f32 %v220_v7, %v170_v9 }
 0x14d   :  { %v223_v13 = vmul.f32 %v221_v11, %v171_v10 }
 0x14f   :  { %v224_v14 = vpack.c.bf16 %v223_v13, %v222_v12 }
 0x151   :  { %603 = vmatmul.mubr.bf16.vlgmr.msra.gmra.mrb[0].mxu1 %v224_v14 }
 0x224   :  { %v330_v24 = vpop.f32.mrb[0].mxu1 }
 0x225   :  { %v331_v25 = vadd.f32 %v521_v23, %v330_v24  ;;  %v604_v26 = vpop.f32.mrb[1].mxu1 }
 0x226   :  { %v333_v27 = vpop.f32.mrb[2].mxu1 }
 0x227   :  { %v339_v28 = vmul.f32 0.70710677, %v331_v25  ;;  %v334_v29 = vadd.f32 %v521_v23, %v333_v27  ;;  %v605_v30 = vpop.f32.mrb[3].mxu1  ;;  %v337_v11 = vmul.f32 0.5, %v331_v25 }
 0x229   :  { %v341_v31 = vand.u32 2147483647, %v339_v28  ;;  %v340_v32 = vmul.f32 0.70710677, %v334_v29  ;;  %vm381_vm3 = vcmp.lt.f32.partialorder %v339_v28, 0.0  ;;  %v338_v12 = vmul.f32 0.5, %v334_v29 }
 0x22b   :  { %v343_v33 = vmul.f32 0.3275911, %v341_v31  ;;  %v342_v34 = vand.u32 2147483647, %v340_v32  ;;  %v369_v37 = vsub.f32 0.0, %v341_v31  ;;  %vm382_vm4 = vcmp.lt.f32.partialorder %v340_v32, 0.0 }
 0x22d   :  { %v345_v35 = vadd.f32 1.0, %v343_v33  ;;  %v344_v36 = vmul.f32 0.3275911, %v342_v34  ;;  %v370_v38 = vsub.f32 0.0, %v342_v34  ;;  %v371_v40 = vmul.f32 %v369_v37, %v341_v31 }
 0x22f   :  { %664 = vrcp.f32 %v345_v35  ;;  %v346_v0 = vadd.f32 1.0, %v344_v36  ;;  %v372_v44 = vmul.f32 %v370_v38, %v342_v34  ;;  %v373_v45 = vmul.f32 1.442695, %v371_v40 }
 0x231   :  { %666 = vrcp.f32 %v346_v0  ;;  %v375_v50 = vmul.f32 1.442695, %v372_v44 }
 0x232   :  { %668 = vpow2.f32 %v373_v45 }
 0x233   :  { %670 = vpow2.f32 %v375_v50 }
 0x239   :  { %v665_v39 = vpop.eup %664 }
 0x23a   :  { %v351_v41 = vmul.f32 1.0614054, %v665_v39 }
 0x23b   :  { %v667_v42 = vpop.eup %666 }
 0x23c   :  { %v353_v43 = vadd.f32 -1.4531521, %v351_v41  ;;  %v352_v46 = vmul.f32 1.0614054, %v667_v42  ;;  %v669_v61 = vpop.eup %668 }
 0x23d   :  { %v671_v2 = vpop.eup %670 }
 0x23e   :  { %v355_v47 = vmul.f32 %v665_v39, %v353_v43  ;;  %v354_v48 = vadd.f32 -1.4531521, %v352_v46 }
 0x240   :  { %v357_v49 = vadd.f32 1.4214138, %v355_v47  ;;  %v356_v51 = vmul.f32 %v667_v42, %v354_v48 }
 0x242   :  { %v359_v52 = vmul.f32 %v665_v39, %v357_v49  ;;  %v358_v53 = vadd.f32 1.4214138, %v356_v51 }
 0x244   :  { %v361_v54 = vadd.f32 -0.28449672, %v359_v52  ;;  %v360_v55 = vmul.f32 %v667_v42, %v358_v53 }
 0x246   :  { %v363_v56 = vmul.f32 %v665_v39, %v361_v54  ;;  %v362_v57 = vadd.f32 -0.28449672, %v360_v55 }
 0x248   :  { %v365_v58 = vadd.f32 0.2548296, %v363_v56  ;;  %v364_v59 = vmul.f32 %v667_v42, %v362_v57 }
 0x24a   :  { %v367_v60 = vmul.f32 %v665_v39, %v365_v58  ;;  %v366_v62 = vadd.f32 0.2548296, %v364_v59 }
 0x24c   :  { %v377_v63 = vmul.f32 %v669_v61, %v367_v60  ;;  %v368_v1 = vmul.f32 %v667_v42, %v366_v62 }
 0x24e   :  { %v379_v3 = vsub.f32 1.0, %v377_v63  ;;  %v378_v4 = vmul.f32 %v671_v2, %v368_v1 }
 0x250   :  { %v383_v5 = vsub.f32 0.0, %v379_v3  ;;  %v380_v6 = vsub.f32 1.0, %v378_v4 }
 0x252   :  { %v385_v7 = vsel %vm381_vm3, %v383_v5, %v379_v3  ;;  %v384_v8 = vsub.f32 0.0, %v380_v6 }
 0x253   :  { %v387_v9 = vadd.f32 1.0, %v385_v7 }
 0x254   :  { %v386_v10 = vsel %vm382_vm4, %v384_v8, %v380_v6 }
 0x255   :  { %v388_v13 = vadd.f32 1.0, %v386_v10  ;;  %v389_v14 = vmul.f32 %v387_v9, %v337_v11 }
 0x257   :  { %v390_v15 = vmul.f32 %v388_v13, %v338_v12 }
 0x259   :  { %v391_v16 = vpack.c.bf16 %v390_v15, %v389_v14 }
 0x25b   :  { %623 = vmatmul.mubr.bf16.vlgmr.msra.gmra.mrb[4].mxu0 %v391_v16 }
 0x32e   :  { %v497_v18 = vpop.f32.mrb[4].mxu0 }
 0x32f   :  { %v498_v19 = vadd.f32 %v530_v17, %v497_v18  ;;  %v624_v20 = vpop.f32.mrb[5].mxu0 }
 0x330   :  { %v500_v21 = vpop.f32.mrb[6].mxu0 }
 0x331   :  { %504 = vst [vmem:[%s872_s7] sm:$0xff] %v498_v19  ;;  %v501_v22 = vadd.f32 %v530_v17, %v500_v21  ;;  %v625_v23 = vpop.f32.mrb[7].mxu0 }
 0x333   :  { %505 = vst [vmem:[%s872_s7 + $0x8] sm:$0xff] %v501_v22 }
 0x334   :  { %510 = vsyncpa [#allocation3], 1 }
 0x335   :  { %511 = vsyncpa [#allocation5], 1 }

</bundles_post_ra>
